<compile_context>
chip_gen: v5e
topology: v5e:2x2
jax: 0.10.0
libtpu: 0.0.40
codegen_flags: <defaults>
</compile_context>

<pallas_src>
import functools

import jax
import jax.numpy as jnp
from jax.experimental import pallas as pl
from jax.experimental.pallas import tpu as pltpu

LANE = 128
SUBLANE = 8
MAX_BATCH_TILE = 1024
NEG_BIG = -1e30  # bias for padded action columns -> softmax prob exactly 0


def _round_up(n, m):
    return ((n + m - 1) // m) * m


def _policy_kernel(x_ref, w1_ref, b1_ref, w2_ref, b2_ref, out_ref):
    # x_ref:  (Bt, S)  f32     w1_ref: (S, Hp)  bf16    b1_ref: (1, Hp) f32
    # w2_ref: (Hp, Ap) bf16    b2_ref: (1, Ap)  f32     out_ref:(Bt, Ap) f32
    x = x_ref[...].astype(jnp.bfloat16)

    # f1 + ReLU (bf16 MXU operands, f32 accumulation; bias/ReLU in f32)
    h = jnp.dot(x, w1_ref[...], preferred_element_type=jnp.float32) + b1_ref[...]
    h = jnp.maximum(h, 0.0)

    # f2: padded action columns have zero weights and NEG_BIG bias.
    logits = (jnp.dot(h.astype(jnp.bfloat16), w2_ref[...],
                      preferred_element_type=jnp.float32) + b2_ref[...])

    # Row-wise stable softmax over the action axis (== PyTorch dim=0 for 1-D x).
    m = jnp.max(logits, axis=-1, keepdims=True)
    e = jnp.exp(logits - m)                      # padded cols: exp(-1e30) == 0
    denom = jnp.sum(e, axis=-1, keepdims=True)   # >= 1, never zero
    inv = 1.0 / denom                            # EXACT reciprocal (Bt values)
    out_ref[...] = (e * inv).astype(out_ref.dtype)


def pad_policy_params(w1, b1, w2, b2):
    """One-time padding/casting of the Linear params (outside the hot path).

    Hidden dim is padded only to the sublane granule (8); action dim is padded
    to the lane width (128) so the output block is lane-dense.  Padded hidden
    entries are zero (inert through ReLU / second matmul); padded action biases
    are very negative so their softmax probability underflows to exactly 0.
    Weights are stored in bf16 (native MXU input dtype); biases stay f32.
    """
    S, H = w1.shape
    A = w2.shape[1]
    Hp = _round_up(H, SUBLANE)
    Ap = _round_up(A, LANE)
    w1p = jnp.zeros((S, Hp), jnp.bfloat16).at[:, :H].set(w1.astype(jnp.bfloat16))
    b1p = jnp.zeros((1, Hp), jnp.float32).at[0, :H].set(b1.astype(jnp.float32))
    w2p = jnp.zeros((Hp, Ap), jnp.bfloat16).at[:H, :A].set(w2.astype(jnp.bfloat16))
    b2p = jnp.full((1, Ap), NEG_BIG, jnp.float32).at[0, :A].set(b2.astype(jnp.float32))
    return w1p, b1p, w2p, b2p


def _pick_batch_tile(B):
    """Batch tile: multiple of 8, capped at 1024, >= 2 grid steps when B > 8."""
    if B <= SUBLANE:
        return SUBLANE
    half = -(-B // 2)  # cdiv(B, 2): guarantees >= 2 steps for v7x megacore
    return min(MAX_BATCH_TILE, _round_up(half, SUBLANE))


def policy_probs_padded(x, w1p, b1p, w2p, b2p):
    """x: (B, S) f32 -> padded probabilities (Bp, 128) f32 (rows >= B, cols >= A
    are junk / zero).  Callers in a throughput loop can consume this directly
    and slice lazily at point of use."""
    B, S = x.shape
    Hp = w1p.shape[1]
    Ap = w2p.shape[1]

    Bt = _pick_batch_tile(B)
    rem = B % Bt
    if rem:
        xp = jnp.pad(x.astype(jnp.float32), ((0, Bt - rem), (0, 0)))
    else:
        xp = x.astype(jnp.float32)
    Bp = xp.shape[0]
    grid = (Bp // Bt,)

    cost = pl.CostEstimate(
        flops=2 * Bp * (S * Hp + Hp * Ap),
        transcendentals=Bp * Ap,
        bytes_accessed=(Bp * S * 4 + S * Hp * 2 + Hp * 4
                        + Hp * Ap * 2 + Ap * 4 + Bp * Ap * 4),
    )

    return pl.pallas_call(
        _policy_kernel,
        out_shape=jax.ShapeDtypeStruct((Bp, Ap), jnp.float32),
        grid=grid,
        in_specs=[
            pl.BlockSpec((Bt, S), lambda i: (i, 0)),   # per-tile batch of states
            pl.BlockSpec((S, Hp), lambda i: (0, 0)),   # weights resident across grid
            pl.BlockSpec((1, Hp), lambda i: (0, 0)),
            pl.BlockSpec((Hp, Ap), lambda i: (0, 0)),
            pl.BlockSpec((1, Ap), lambda i: (0, 0)),
        ],
        out_specs=pl.BlockSpec((Bt, Ap), lambda i: (i, 0)),  # lane-dense output
        compiler_params=pltpu.CompilerParams(
            dimension_semantics=("parallel",)),
        cost_estimate=cost,
    )(xp, w1p, b1p, w2p, b2p)


@functools.partial(jax.jit, static_argnames=("action_size",))
def policy_forward_batched(x, w1p, b1p, w2p, b2p, *, action_size):
    """x: (B, state_size) -> per-state action probabilities (B, action_size)."""
    out = policy_probs_padded(x, w1p, b1p, w2p, b2p)
    return out[: x.shape[0], :action_size]


def policy_forward(state, w1p, b1p, w2p, b2p, action_size):
    """Single state (state_size,) -> probs (action_size,).

    Matches the PyTorch module exactly: softmax(dim=0) of a 1-D input is the
    softmax over the action axis.
    """
    probs = policy_forward_batched(
        state.reshape(1, -1), w1p, b1p, w2p, b2p, action_size=action_size)
    return probs[0]


def init_policy_params(key, state_size, hidden_size, action_size):
    """Deterministic init mimicking nn.Linear (uniform +/- 1/sqrt(fan_in))."""
    k1, k2, k3, k4 = jax.random.split(key, 4)
    bound1 = 1.0 / jnp.sqrt(jnp.float32(state_size))
    bound2 = 1.0 / jnp.sqrt(jnp.float32(hidden_size))
    w1 = jax.random.uniform(k1, (state_size, hidden_size), jnp.float32, -bound1, bound1)
    b1 = jax.random.uniform(k2, (hidden_size,), jnp.float32, -bound1, bound1)
    w2 = jax.random.uniform(k3, (hidden_size, action_size), jnp.float32, -bound2, bound2)
    b2 = jax.random.uniform(k4, (action_size,), jnp.float32, -bound2, bound2)
    return w1, b1, w2, b2


def _ref_f32(x, w1, b1, w2, b2):
    h = jnp.maximum(x @ w1 + b1, 0.0)
    return jax.nn.softmax(h @ w2 + b2, axis=-1)


def _ref_bf16_path(x, w1p, b1p, w2p, b2p, action_size):
    """Plain-JAX emulation of the kernel's exact numerics (bf16 matmul operands,
    f32 accumulation / bias / softmax, NEG_BIG-masked padded action columns)."""
    xb = x.astype(jnp.bfloat16)
    h = jnp.dot(xb, w1p, preferred_element_type=jnp.float32) + b1p
    h = jnp.maximum(h, 0.0)
    logits = jnp.dot(h.astype(jnp.bfloat16), w2p,
                     preferred_element_type=jnp.float32) + b2p
    return jax.nn.softmax(logits, axis=-1)[:, :action_size]


if __name__ == "__main__":
    # LunarLander-v2: state_size=8, action_size=4; small hidden layer.
    state_size, action_size, hidden_size = 8, 4, 32
    batch = 2  # small batched example (a couple of env states at once)

    key = jax.random.PRNGKey(0)
    k_params, k_state, k_batch = jax.random.split(key, 3)
    w1, b1, w2, b2 = init_policy_params(k_params, state_size, hidden_size, action_size)
    w1p, b1p, w2p, b2p = pad_policy_params(w1, b1, w2, b2)

    # --- single-state path (exactly the PyTorch module's forward) ---
    state = jax.random.normal(k_state, (state_size,), jnp.float32)
    probs = jax.block_until_ready(
        policy_forward(state, w1p, b1p, w2p, b2p, action_size))
    assert probs.shape == (action_size,)
    # vs full-f32 reference (loose: bf16 matmul operands in the kernel)
    assert jnp.allclose(probs, _ref_f32(state, w1, b1, w2, b2), atol=1e-2, rtol=1e-2)
    # vs same-numerics reference (tight)
    assert jnp.allclose(
        probs,
        _ref_bf16_path(state.reshape(1, -1), w1p, b1p, w2p, b2p, action_size)[0],
        atol=2e-3, rtol=2e-3)
    # exact reciprocal -> probabilities really sum to 1
    assert jnp.allclose(jnp.sum(probs), 1.0, atol=1e-3)

    # --- small batched path ---
    states = jax.random.normal(k_batch, (batch, state_size), jnp.float32)
    probs_b = jax.block_until_ready(
        policy_forward_batched(states, w1p, b1p, w2p, b2p, action_size=action_size))
    assert probs_b.shape == (batch, action_size)
    assert jnp.allclose(probs_b, _ref_f32(states, w1, b1, w2, b2), atol=1e-2, rtol=1e-2)
    assert jnp.allclose(probs_b,
                        _ref_bf16_path(states, w1p, b1p, w2p, b2p, action_size),
                        atol=2e-3, rtol=2e-3)
    assert jnp.allclose(jnp.sum(probs_b, axis=-1), 1.0, atol=1e-3)

    # --- larger batch: exercises a >= 2-step "parallel" grid and ragged padding ---
    big = jax.random.normal(jax.random.PRNGKey(1), (260, state_size), jnp.float32)
    probs_big = jax.block_until_ready(
        policy_forward_batched(big, w1p, b1p, w2p, b2p, action_size=action_size))
    assert probs_big.shape == (260, action_size)
    assert jnp.allclose(probs_big, _ref_f32(big, w1, b1, w2, b2), atol=1e-2, rtol=1e-2)
    assert jnp.allclose(jnp.sum(probs_big, axis=-1), 1.0, atol=1e-3)

    # TODO(synk): Categorical sampling / log_prob (select_action) stays outside
    # the kernel; it is not part of Policy.forward.
    print("KERNEL_OK")
</pallas_src>

<mosaic_0001>
module attributes {stable_mosaic.version = 11 : i64} {
  func.func @_policy_kernel(%arg0: i32, %arg1: memref<8x8xf32, #tpu.memory_space<vmem>>, %arg2: memref<8x32xbf16, #tpu.memory_space<vmem>>, %arg3: memref<1x32xf32, #tpu.memory_space<vmem>>, %arg4: memref<32x128xbf16, #tpu.memory_space<vmem>>, %arg5: memref<1x128xf32, #tpu.memory_space<vmem>>, %arg6: memref<8x128xf32, #tpu.memory_space<vmem>>) attributes {dimension_semantics = [#tpu.dimension_semantics<parallel>], iteration_bounds = array<i64: 1>, scalar_prefetch = 0 : i64, scratch_operands = 0 : i64, tpu.core_type = #tpu.core_type<tc>, window_params = [{transform_indices = @transform_0, window_bounds = array<i64: 8, 8>}, {pipeline_mode = #tpu.pipeline_mode<synchronous>, transform_indices = @transform_1, window_bounds = array<i64: 8, 32>}, {pipeline_mode = #tpu.pipeline_mode<synchronous>, transform_indices = @transform_2, window_bounds = array<i64: 1, 32>}, {pipeline_mode = #tpu.pipeline_mode<synchronous>, transform_indices = @transform_3, window_bounds = array<i64: 32, 128>}, {pipeline_mode = #tpu.pipeline_mode<synchronous>, transform_indices = @transform_4, window_bounds = array<i64: 1, 128>}, {transform_indices = @transform_5, window_bounds = array<i64: 8, 128>}]} {
    %c0 = arith.constant 0 : index
    %c0_0 = arith.constant 0 : index
    %0 = vector.load %arg1[%c0, %c0_0] : memref<8x8xf32, #tpu.memory_space<vmem>>, vector<8x8xf32>
    %1 = arith.truncf %0 : vector<8x8xf32> to vector<8x8xbf16>
    %c0_1 = arith.constant 0 : index
    %c0_2 = arith.constant 0 : index
    %2 = vector.load %arg2[%c0_1, %c0_2] : memref<8x32xbf16, #tpu.memory_space<vmem>>, vector<8x32xbf16>
    %cst = arith.constant dense<0.000000e+00> : vector<8x32xf32>
    %3 = tpu.matmul %1, %2, %cst {dimension_numbers = #tpu.dot_dimension_numbers<[1], [0], [0], [1], [0, 0, 1, 1], [], []>} : vector<8x8xbf16>, vector<8x32xbf16>, vector<8x32xf32> -> vector<8x32xf32>
    %c0_3 = arith.constant 0 : index
    %c0_4 = arith.constant 0 : index
    %4 = vector.load %arg3[%c0_3, %c0_4] : memref<1x32xf32, #tpu.memory_space<vmem>>, vector<1x32xf32>
    %5 = vector.broadcast %4 : vector<1x32xf32> to vector<8x32xf32>
    %6 = arith.addf %3, %5 : vector<8x32xf32>
    %cst_5 = arith.constant 0.000000e+00 : f32
    %7 = vector.broadcast %cst_5 : f32 to vector<8x32xf32>
    %8 = arith.maximumf %6, %7 : vector<8x32xf32>
    %9 = arith.truncf %8 : vector<8x32xf32> to vector<8x32xbf16>
    %c0_6 = arith.constant 0 : index
    %c0_7 = arith.constant 0 : index
    %10 = vector.load %arg4[%c0_6, %c0_7] : memref<32x128xbf16, #tpu.memory_space<vmem>>, vector<32x128xbf16>
    %cst_8 = arith.constant dense<0.000000e+00> : vector<8x128xf32>
    %11 = tpu.matmul %9, %10, %cst_8 {dimension_numbers = #tpu.dot_dimension_numbers<[1], [0], [0], [1], [0, 0, 1, 1], [], []>} : vector<8x32xbf16>, vector<32x128xbf16>, vector<8x128xf32> -> vector<8x128xf32>
    %c0_9 = arith.constant 0 : index
    %c0_10 = arith.constant 0 : index
    %12 = vector.load %arg5[%c0_9, %c0_10] : memref<1x128xf32, #tpu.memory_space<vmem>>, vector<1x128xf32>
    %13 = vector.broadcast %12 : vector<1x128xf32> to vector<8x128xf32>
    %14 = arith.addf %11, %13 : vector<8x128xf32>
    %cst_11 = arith.constant dense<0xFF800000> : vector<8xf32>
    %15 = vector.multi_reduction <maximumf>, %14, %cst_11 [1] : vector<8x128xf32> to vector<8xf32>
    %16 = vector.shape_cast %15 : vector<8xf32> to vector<8x1xf32>
    %17 = vector.broadcast %16 : vector<8x1xf32> to vector<8x128xf32>
    %18 = arith.subf %14, %17 : vector<8x128xf32>
    %19 = math.exp %18 : vector<8x128xf32>
    %cst_12 = arith.constant dense<0.000000e+00> : vector<8xf32>
    %20 = vector.multi_reduction <add>, %19, %cst_12 [1] : vector<8x128xf32> to vector<8xf32>
    %21 = vector.shape_cast %20 : vector<8xf32> to vector<8x1xf32>
    %cst_13 = arith.constant 1.000000e+00 : f32
    %22 = vector.broadcast %cst_13 : f32 to vector<8x1xf32>
    %23 = arith.divf %22, %21 : vector<8x1xf32>
    %24 = vector.broadcast %23 : vector<8x1xf32> to vector<8x128xf32>
    %25 = arith.mulf %19, %24 : vector<8x128xf32>
    %c0_14 = arith.constant 0 : index
    %c0_15 = arith.constant 0 : index
    %26 = vector.load %arg6[%c0_14, %c0_15] : memref<8x128xf32, #tpu.memory_space<vmem>>, vector<8x128xf32>
    tpu.vector_store %arg6[%c0_14, %c0_15], %25 {strides = array<i32>} : memref<8x128xf32, #tpu.memory_space<vmem>>, vector<8x128xf32>,
    return
  }
  func.func @transform_0(%arg0: i32) -> (i32, i32) {
    %c0_i32 = arith.constant 0 : i32
    %c0_i32_0 = arith.constant 0 : i32
    return %arg0, %c0_i32 : i32, i32
  }
  func.func @transform_1(%arg0: i32) -> (i32, i32) {
    %c0_i32 = arith.constant 0 : i32
    %c0_i32_0 = arith.constant 0 : i32
    %c0_i32_1 = arith.constant 0 : i32
    return %c0_i32, %c0_i32_0 : i32, i32
  }
  func.func @transform_2(%arg0: i32) -> (i32, i32) {
    %c0_i32 = arith.constant 0 : i32
    %c0_i32_0 = arith.constant 0 : i32
    %c0_i32_1 = arith.constant 0 : i32
    return %c0_i32, %c0_i32_0 : i32, i32
  }
  func.func @transform_3(%arg0: i32) -> (i32, i32) {
    %c0_i32 = arith.constant 0 : i32
    %c0_i32_0 = arith.constant 0 : i32
    %c0_i32_1 = arith.constant 0 : i32
    return %c0_i32, %c0_i32_0 : i32, i32
  }
  func.func @transform_4(%arg0: i32) -> (i32, i32) {
    %c0_i32 = arith.constant 0 : i32
    %c0_i32_0 = arith.constant 0 : i32
    %c0_i32_1 = arith.constant 0 : i32
    return %c0_i32, %c0_i32_0 : i32, i32
  }
  func.func @transform_5(%arg0: i32) -> (i32, i32) {
    %c0_i32 = arith.constant 0 : i32
    %c0_i32_0 = arith.constant 0 : i32
    return %arg0, %c0_i32 : i32, i32
  }
}

</mosaic_0001>

<bundles_post_ra>
// kernel: policy_forward_batched.1
= control target key start
LH: loop header
LB: loop body
LE: loop exit
PB: predicated region body
PF: predicated region fallthrough
CT: control target
= control target key end

     0   :  { %10 = vsyncpa [#allocation3], 0  ;;  %s180_s21 = smov [#allocation2]   ;;  %s181_s23 = smov 64   ;;  %s231_s0 = inlined_call_operand.vmem [shape: f32[8,8], index: 0, kind: input, shape index: {}]   ;;  %s232_s1 = inlined_call_operand.vmem [shape: bf16[8,32], index: 1, kind: input, shape index: {}]   ;;  %s233_s2 = inlined_call_operand.vmem [shape: f32[1,32], index: 2, kind: input, shape index: {}]   ;;  %s234_s3 = inlined_call_operand.hbm [shape: bf16[32,128], index: 3, kind: input, shape index: {}]   ;;  %s235_s4 = inlined_call_operand.vmem [shape: f32[1,128], index: 4, kind: input, shape index: {}]   ;;  %s236_s5 = inlined_call_operand.vmem [shape: f32[8,128], index: 5, kind: output, shape index: {}]  }
   0x1   :  { %s21_s20 = sshll.u32 %s234_s3, 4  ;;  %s23_s22 = sshll.u32 %s180_s21, 4  ;;  %s22_s20 = int_to_ptr.hbm [resolvable:$true] %s21_s20  ;;  %s24_s22 = int_to_ptr.vmem [resolvable:$true] %s23_s22 }
   0x2   :  { %s182_s24 = smov 4  }
   0x3   :  { %29 = dma.hbm_to_vmem [thread:$0]  %s22_s20, 256, %s24_s22, [#allocation3], %s181_s23, %s181_s23, %s182_s24  }
   0x4   :  { %178 = dma.done.wait [#allocation3], 256  }
   0x5   :  { %179 = vsyncadd [#allocation3], 4294967040  ;;  %vm48_vm0 = vcmask 1043456   ;;  %v39_v0 = vld [vmem:[%s232_s1] sm:$0xf]  ;;  %vm44_vm1 = vcmask 64512  }
   0x6   :  { %v37_v1 = vld [vmem:[%s231_s0] sm:$0xff]  ;;  %v50_v2 = vsel %vm48_vm0, %v39_v0, 0  ;;  %v144_v4 = vld [vmem:[#allocation2 + $0x8] sm:$0xff]  ;;  %vm87_vm2 = vcmask 261120  }
   0x7   :  { %v38_v3 = vpack.c.bf16 %v37_v1, %v37_v1  ;;  %59 = vmatpush.bf16.msra.mxu0 %v50_v2  ;;  %97 = vmatpush.bf16.msra.mxu1 %v144_v4  ;;  %v143_v5 = vld [vmem:[#allocation2] sm:$0xff] }
   0x8   :  { %v148_v6 = vld [vmem:[%s233_s2] ss:$0 sm:$0xff] }
   0x9   :  { %v149_v12 = vld [vmem:[%s235_s4] ss:$0 sm:$0xff] }
   0xa   :  { %133 = vmatmul.msk.bf16.vlgmr.msra.gmra.mxu0 %vm44_vm1, %v38_v3 }
   0xb   :  { %98 = vmatpush.bf16.msra.mxu1 %v143_v5 }
  0x87   :  { %v61_v7 = vpop.f32.mrf.mxu0 }
  0x88   :  { %v62_v8 = vadd.f32 %v148_v6, %v61_v7 }
  0x8a   :  { %v65_v9 = vmax.f32 %v62_v8, 0.0 }
  0x8c   :  { %v66_v10 = vpack.c.bf16 %v65_v9, %v65_v9 }
  0x8e   :  { %142 = vmatmul.msk.bf16.vlgmr.msra.gmra.mxu1 %vm87_vm2, %v66_v10 }
  0x8f   :  { %v63_v11 = vpop.f32.mrf.mxu0 }
 0x10b   :  { %v100_v13 = vpop.f32.mrf.mxu1 }
 0x10c   :  { %v101_v14 = vadd.f32 %v149_v12, %v100_v13 }
 0x10e   :  { %104 = vmax.xlane.f32.xlu0 %v101_v14 }
 0x113   :  { %v102_v15 = vpop.f32.mrf.mxu1 }
 0x181   :  { %v105_v16 = vpop.xlane.xlu0 %104 }
 0x182   :  { %v106_v17 = vsub.f32 %v101_v14, %v105_v16 }
 0x184   :  { %v107_v18 = vmul.f32 1.442695, %v106_v17 }
 0x186   :  { %150 = vpow2.f32 %v107_v18 }
 0x18c   :  { %v151_v19 = vpop.eup %150 }
 0x18d   :  { %109 = vadd.xlane.f32.xlu0 %v151_v19 }
 0x200   :  { %v110_v20 = vpop.xlane.xlu0 %109 }
 0x201   :  { %152 = vrcp.f32 %v110_v20  ;;  %v122_v24 = vand.u32 2147483648, %v110_v20  ;;  %v120_v26 = vand.u32 2147483647, %v110_v20  ;;  %vm116_vm4 = vweird.f32 %v110_v20 }
 0x203   :  { %v123_v28 = vor.u32 1.1754944e-38, %v122_v24  ;;  %vm121_vm6 = vcmp.eq.f32.partialorder %v120_v26, 8.507059e+37 }
 0x207   :  { %v153_v21 = vpop.eup %152 }
 0x208   :  { %v112_v22 = vmul.f32 %v153_v21, %v110_v20  ;;  %vm117_vm3 = vweird.f32 %v153_v21 }
 0x209   :  { %vm118_vm5 = vmor %vm116_vm4, %vm117_vm3 }
 0x20a   :  { %v113_v23 = vsub.f32 1.0, %v112_v22 }
 0x20c   :  { %v114_v25 = vmul.f32 %v153_v21, %v113_v23 }
 0x20e   :  { %v115_v27 = vadd.f32 %v153_v21, %v114_v25 }
 0x210   :  { %v119_v29 = vsel %vm118_vm5, %v153_v21, %v115_v27 }
 0x211   :  { %v124_v30 = vsel %vm121_vm6, %v123_v28, %v119_v29 }
 0x212   :  { %v126_v31 = vmul.f32 %v151_v19, %v124_v30 }
 0x214   :  { %127 = vst [vmem:[%s236_s5] sm:$0xff] %v126_v31 }
 0x215   :  { %132 = vsyncpa [#allocation3], 1 }

</bundles_post_ra>
